<compile_context>
chip_gen: v5e
topology: v5e:2x2
jax: 0.10.0
libtpu: 0.0.40
codegen_flags: <defaults>
</compile_context>

<pallas_src>
import jax
import jax.numpy as jnp
from jax.experimental import pallas as pl
from jax.experimental.pallas import tpu as pltpu

EPS = 1e-5


def _layernorm_nchw_kernel(x_ref, w_ref, b_ref, o_ref):
    # x_ref / o_ref: (C, tile_hw)  or  (Bt, C, HW)
    # w_ref / b_ref: (C, 1)  -- broadcasts against either block shape.
    x = x_ref[...].astype(jnp.float32)
    mean = jnp.mean(x, axis=-2, keepdims=True)           # reduce over C (sublane axis)
    xc = x - mean
    var = jnp.mean(xc * xc, axis=-2, keepdims=True)      # biased variance (PyTorch LayerNorm)
    y = xc * jax.lax.rsqrt(var + EPS)
    y = y * w_ref[...].astype(jnp.float32) + b_ref[...].astype(jnp.float32)
    o_ref[...] = y.astype(o_ref.dtype)


def _cdiv(a, b):
    return (a + b - 1) // b


def _round_up(x, m):
    return _cdiv(x, m) * m


def _vmem_capacity_bytes():
    try:
        info = pltpu.get_tpu_info()
        cap = getattr(info, "vmem_capacity_bytes", None)
        if cap:
            return int(cap)
    except Exception:
        pass
    return 64 * 1024 * 1024  # conservative fallback (v7x per-TC VMEM)


def _pick_tiles(B, C, HW, itemsize, tile_hw=None):
    """Choose blocking so double-buffered in+out blocks (with sublane padding)
    stay well inside scoped VMEM on v5e/v6e/v7x while blocks are big enough
    (~4-8 MiB) to amortize the ~0.35us per-grid-step overhead."""
    pack = max(1, 32 // itemsize)              # sublane pack: 8 f32, 16 bf16, 32 int8
    c_pad = _round_up(C, pack)                 # VMEM-padded channel count
    hw_pad = _round_up(HW, 128)

    vmem_cap = _vmem_capacity_bytes()
    vmem_budget = min(40 * 1024 * 1024, vmem_cap // 2)          # headroom on 64 MiB v7x
    target = max(512 * 1024, min(6 * 1024 * 1024, vmem_budget // 6))

    slab_bytes = c_pad * hw_pad * itemsize     # one batch image, as padded in VMEM

    # --- batch-folding path: small per-image slabs -> block over batch too ---
    if tile_hw is None and B > 1 and slab_bytes <= target:
        bt = max(1, min(B, target // slab_bytes))
        nb = _cdiv(B, bt)
        if nb < 2:                             # guarantee >=2 steps for v7x megacore
            bt = _cdiv(B, 2)
            nb = _cdiv(B, bt)
        return dict(mode="batch", bt=bt, nb=nb,
                    block_bytes=bt * slab_bytes, vmem_cap=vmem_cap)

    # --- spatial-tiling path: tile the lane (HW) axis -----------------------
    max_tile = max(128, ((vmem_budget // 6) // (c_pad * itemsize)) // 128 * 128)
    if tile_hw is None:
        tile_hw = max(128, (target // (c_pad * itemsize)) // 128 * 128)
    else:
        tile_hw = max(128, _round_up(int(tile_hw), 128))
    tile_hw = min(tile_hw, max_tile)
    if tile_hw >= HW:
        tile_hw = HW                           # full extent: always a legal block
    n_hw = _cdiv(HW, tile_hw)
    if B * n_hw == 1 and HW > 128:             # single step would idle one v7x TC
        tile_hw = _round_up(_cdiv(HW, 2), 128)
        n_hw = _cdiv(HW, tile_hw)
    block_bytes = c_pad * _round_up(min(tile_hw, HW), 128) * itemsize
    return dict(mode="spatial", tile_hw=tile_hw, n_hw=n_hw,
                block_bytes=block_bytes, vmem_cap=vmem_cap)


def layer_norm_proxy(x_nchw, weight, bias, *, tile_hw=None):
    """Forward pass of LayerNormProxy: NCHW in, NCHW out."""
    B, C, H, W = x_nchw.shape
    HW = H * W
    x = x_nchw.reshape(B, C, HW)               # contiguous reshape: no data movement
    itemsize = jnp.dtype(x.dtype).itemsize

    cfg = _pick_tiles(B, C, HW, itemsize, tile_hw)

    w2 = weight.reshape(C, 1)
    b2 = bias.reshape(C, 1)

    cost = pl.CostEstimate(
        flops=8 * B * C * HW,
        transcendentals=B * HW,                # one rsqrt per spatial position
        bytes_accessed=2 * B * C * HW * itemsize + 2 * C * itemsize,
    )

    if cfg["mode"] == "batch":
        bt = cfg["bt"]
        grid = (cfg["nb"],)
        in_specs = [
            pl.BlockSpec((bt, C, HW), lambda i: (i, 0, 0)),
            pl.BlockSpec((C, 1), lambda i: (0, 0)),
            pl.BlockSpec((C, 1), lambda i: (0, 0)),
        ]
        out_specs = pl.BlockSpec((bt, C, HW), lambda i: (i, 0, 0))
        dim_sem = ("parallel",)
    else:
        thw = cfg["tile_hw"]
        grid = (B, cfg["n_hw"])
        in_specs = [
            # batch dim squeezed out of the kernel view -> kernel sees (C, tile_hw)
            pl.BlockSpec((None, C, thw), lambda b, j: (b, 0, j)),
            pl.BlockSpec((C, 1), lambda b, j: (0, 0)),
            pl.BlockSpec((C, 1), lambda b, j: (0, 0)),
        ]
        out_specs = pl.BlockSpec((None, C, thw), lambda b, j: (b, 0, j))
        dim_sem = ("parallel", "parallel")

    # Scoped VMEM: double-buffered in+out blocks (sublane-padded) + headroom,
    # never above the physical capacity of this generation.
    vmem_limit = int(min(max(32 * 1024 * 1024, 6 * cfg["block_bytes"]),
                         cfg["vmem_cap"]))

    y = pl.pallas_call(
        _layernorm_nchw_kernel,
        out_shape=jax.ShapeDtypeStruct((B, C, HW), x.dtype),
        grid_spec=pltpu.PrefetchScalarGridSpec(
            num_scalar_prefetch=0,
            grid=grid,
            in_specs=in_specs,
            out_specs=out_specs,
        ),
        compiler_params=pltpu.CompilerParams(
            dimension_semantics=dim_sem,
            vmem_limit_bytes=vmem_limit,
        ),
        cost_estimate=cost,
    )(x, w2, b2)

    return y.reshape(B, C, H, W)


def _reference(x_nchw, weight, bias):
    x = jnp.transpose(x_nchw, (0, 2, 3, 1)).astype(jnp.float32)
    mean = jnp.mean(x, axis=-1, keepdims=True)
    var = jnp.mean((x - mean) ** 2, axis=-1, keepdims=True)
    y = (x - mean) * jax.lax.rsqrt(var + EPS)
    y = y * weight.astype(jnp.float32) + bias.astype(jnp.float32)
    return jnp.transpose(y, (0, 3, 1, 2)).astype(x_nchw.dtype)


if __name__ == "__main__":
    key = jax.random.PRNGKey(0)

    # Primary test (matches the module's typical small config): f32, batch-fold path.
    B, C, H, W = 2, 4, 16, 16
    x = jax.random.normal(key, (B, C, H, W), dtype=jnp.float32)
    weight = 1.0 + 0.01 * jnp.arange(C, dtype=jnp.float32)
    bias = 0.001 * jnp.arange(C, dtype=jnp.float32)

    out = jax.block_until_ready(layer_norm_proxy(x, weight, bias))
    ref = _reference(x, weight, bias)
    assert out.shape == (B, C, H, W)
    assert jnp.allclose(out, ref, atol=1e-5, rtol=1e-5), "f32 mismatch vs reference"

    # Spatial-tiling path with forced >=2 steps and a partial (non-128) tail tile.
    k2 = jax.random.PRNGKey(1)
    x2 = jax.random.normal(k2, (1, 8, 40, 40), dtype=jnp.float32)
    w2 = 1.0 + 0.02 * jnp.arange(8, dtype=jnp.float32)
    b2 = 0.01 * jnp.arange(8, dtype=jnp.float32)
    out2 = jax.block_until_ready(layer_norm_proxy(x2, w2, b2))
    ref2 = _reference(x2, w2, b2)
    assert jnp.allclose(out2, ref2, atol=1e-5, rtol=1e-5), "spatial-path mismatch"

    # bf16 path (sublane pack = 16): looser tolerance due to output rounding.
    x3 = x.astype(jnp.bfloat16)
    out3 = jax.block_until_ready(layer_norm_proxy(x3, weight, bias))
    ref3 = _reference(x3, weight, bias)
    assert jnp.allclose(out3.astype(jnp.float32), ref3.astype(jnp.float32),
                        atol=2e-2, rtol=2e-2), "bf16 mismatch vs reference"

    print("KERNEL_OK")
</pallas_src>

<mosaic_0001>
module attributes {stable_mosaic.version = 11 : i64} {
  func.func @_layernorm_nchw_kernel(%arg0: i32, %arg1: memref<1x4x256xf32, #tpu.memory_space<vmem>>, %arg2: memref<4x1xf32, #tpu.memory_space<vmem>>, %arg3: memref<4x1xf32, #tpu.memory_space<vmem>>, %arg4: memref<1x4x256xf32, #tpu.memory_space<vmem>>) attributes {dimension_semantics = [#tpu.dimension_semantics<parallel>], iteration_bounds = array<i64: 2>, scalar_prefetch = 0 : i64, scratch_operands = 0 : i64, tpu.core_type = #tpu.core_type<tc>, window_params = [{transform_indices = @transform_0, window_bounds = array<i64: 1, 4, 256>}, {pipeline_mode = #tpu.pipeline_mode<synchronous>, transform_indices = @transform_1, window_bounds = array<i64: 4, 1>}, {pipeline_mode = #tpu.pipeline_mode<synchronous>, transform_indices = @transform_2, window_bounds = array<i64: 4, 1>}, {transform_indices = @transform_3, window_bounds = array<i64: 1, 4, 256>}]} {
    %c0 = arith.constant 0 : index
    %c0_0 = arith.constant 0 : index
    %c0_1 = arith.constant 0 : index
    %0 = vector.load %arg1[%c0, %c0_0, %c0_1] : memref<1x4x256xf32, #tpu.memory_space<vmem>>, vector<1x4x256xf32>
    %cst = arith.constant dense<0.000000e+00> : vector<1x256xf32>
    %1 = vector.multi_reduction <add>, %0, %cst [1] : vector<1x4x256xf32> to vector<1x256xf32>
    %2 = vector.shape_cast %1 : vector<1x256xf32> to vector<1x1x256xf32>
    %cst_2 = arith.constant 4.000000e+00 : f32
    %3 = vector.broadcast %cst_2 : f32 to vector<1x1x256xf32>
    %4 = arith.divf %2, %3 : vector<1x1x256xf32>
    %5 = vector.broadcast %4 : vector<1x1x256xf32> to vector<1x4x256xf32>
    %6 = arith.subf %0, %5 : vector<1x4x256xf32>
    %7 = arith.mulf %6, %6 : vector<1x4x256xf32>
    %cst_3 = arith.constant dense<0.000000e+00> : vector<1x256xf32>
    %8 = vector.multi_reduction <add>, %7, %cst_3 [1] : vector<1x4x256xf32> to vector<1x256xf32>
    %9 = vector.shape_cast %8 : vector<1x256xf32> to vector<1x1x256xf32>
    %cst_4 = arith.constant 4.000000e+00 : f32
    %10 = vector.broadcast %cst_4 : f32 to vector<1x1x256xf32>
    %11 = arith.divf %9, %10 : vector<1x1x256xf32>
    %cst_5 = arith.constant 9.99999974E-6 : f32
    %12 = vector.broadcast %cst_5 : f32 to vector<1x1x256xf32>
    %13 = arith.addf %11, %12 : vector<1x1x256xf32>
    %14 = math.rsqrt %13 : vector<1x1x256xf32>
    %15 = vector.broadcast %14 : vector<1x1x256xf32> to vector<1x4x256xf32>
    %16 = arith.mulf %6, %15 : vector<1x4x256xf32>
    %c0_6 = arith.constant 0 : index
    %c0_7 = arith.constant 0 : index
    %17 = vector.load %arg2[%c0_6, %c0_7] : memref<4x1xf32, #tpu.memory_space<vmem>>, vector<4x1xf32>
    %18 = vector.shape_cast %17 : vector<4x1xf32> to vector<1x4x1xf32>
    %19 = vector.broadcast %18 : vector<1x4x1xf32> to vector<1x4x256xf32>
    %20 = arith.mulf %16, %19 : vector<1x4x256xf32>
    %c0_8 = arith.constant 0 : index
    %c0_9 = arith.constant 0 : index
    %21 = vector.load %arg3[%c0_8, %c0_9] : memref<4x1xf32, #tpu.memory_space<vmem>>, vector<4x1xf32>
    %22 = vector.shape_cast %21 : vector<4x1xf32> to vector<1x4x1xf32>
    %23 = vector.broadcast %22 : vector<1x4x1xf32> to vector<1x4x256xf32>
    %24 = arith.addf %20, %23 : vector<1x4x256xf32>
    %c0_10 = arith.constant 0 : index
    %c0_11 = arith.constant 0 : index
    %c0_12 = arith.constant 0 : index
    %25 = vector.load %arg4[%c0_10, %c0_11, %c0_12] : memref<1x4x256xf32, #tpu.memory_space<vmem>>, vector<1x4x256xf32>
    tpu.vector_store %arg4[%c0_10, %c0_11, %c0_12], %24 {strides = array<i32>} : memref<1x4x256xf32, #tpu.memory_space<vmem>>, vector<1x4x256xf32>,
    return
  }
  func.func @transform_0(%arg0: i32) -> (i32, i32, i32) {
    %c0_i32 = arith.constant 0 : i32
    %c0_i32_0 = arith.constant 0 : i32
    %c0_i32_1 = arith.constant 0 : i32
    return %arg0, %c0_i32, %c0_i32_0 : i32, i32, i32
  }
  func.func @transform_1(%arg0: i32) -> (i32, i32) {
    %c0_i32 = arith.constant 0 : i32
    %c0_i32_0 = arith.constant 0 : i32
    %c0_i32_1 = arith.constant 0 : i32
    return %c0_i32, %c0_i32_0 : i32, i32
  }
  func.func @transform_2(%arg0: i32) -> (i32, i32) {
    %c0_i32 = arith.constant 0 : i32
    %c0_i32_0 = arith.constant 0 : i32
    %c0_i32_1 = arith.constant 0 : i32
    return %c0_i32, %c0_i32_0 : i32, i32
  }
  func.func @transform_3(%arg0: i32) -> (i32, i32, i32) {
    %c0_i32 = arith.constant 0 : i32
    %c0_i32_0 = arith.constant 0 : i32
    %c0_i32_1 = arith.constant 0 : i32
    return %arg0, %c0_i32, %c0_i32_0 : i32, i32, i32
  }
}

</mosaic_0001>

<bundles_post_ra>
// kernel: tpu_custom_call.1
= control target key start
LH: loop header
LB: loop body
LE: loop exit
PB: predicated region body
PF: predicated region fallthrough
CT: control target
= control target key end

     0   :  { %8 = vsyncpa [#allocation3], 0  ;;  %s723_s0 = inlined_call_operand.hbm [shape: f32[2,4,256], index: 0, kind: input, shape index: {}]   ;;  %s724_s1 = inlined_call_operand.vmem [shape: f32[4,1], index: 1, kind: input, shape index: {}]   ;;  %s725_s2 = inlined_call_operand.vmem [shape: f32[4,1], index: 2, kind: input, shape index: {}]   ;;  %s726_s3 = inlined_call_operand.hbm [shape: f32[2,4,256], index: 3, kind: output, shape index: {}]  }
   0x1   :  { %10 = vsyncpa [#allocation3 + $0x1], 0 }
   0x2   :  { %11 = vsyncpa [#allocation4], 0 }
   0x3   :  { %13 = vsyncpa [#allocation4 + $0x1], 0  ;;  %s580_s12 = smov 0   ;;  %s582_s13 = smov 0  }
   0x4   :  { %s584_s14 = smov 0   ;;  %s586_s15 = smov 0  }
   0x5 LB: > { %s601_s16 = sadd.s32 4294967295, %s555_s15   ;;  %s387_s17 = sadd.s32 4294967294, %s555_s15   ;;  %s555_s15 = sphi %s586_s15, %s736_s15   ;;  %s551_s14 = sphi %s584_s14, %s735_s14   ;;  %s547_s13 = sphi %s582_s13, %s734_s13   ;;  %s543_s12 = sphi %s580_s12, %s733_s12  }
   0x6   : > { %s605_s18 = sadd.s32 1, %s555_s15   ;;  %s26_s19 = sadd.s32 1, %s551_s14 }
   0x7   : > { %s23_s20 = ssub.s32 %s555_s15, %s605_s18  ;;  %p33_p0 = scmp.ne.s32.totalorder %s551_s14, %s547_s13 }
   0x8   : > { %p24_p1 = scmp.eq.s32.totalorder %s23_s20, 0  ;;  %p34_p2 = scmp.eq.s32.totalorder %s555_s15, 0 }
   0x9   : > { %p39_p3 = scmp.ne.s32.totalorder %s547_s13, %s543_s12  ;;  %p40_p4 = scmp.eq.s32.totalorder %s601_s16, 0 }
   0xa   : > { %s617_s21 = scalar_select %p24_p1, %s551_s14, %s26_s19  }
   0xb   : > { %p619_p5 = por %p34_p2, %p33_p0  ;;  %p623_p6 = por %p40_p4, %p39_p3 }
   0xc   : > { %p105_p7 = scmp.eq.s32.totalorder %s601_s16, 1  ;;  %p111_p8 = scmp.eq.s32.totalorder %s387_s17, 1 }
   0xd   : > { %p415_p10 = scmp.lt.s32.totalorder %s555_s15, 2  ;;  %s137_s26 = sand.u32 1, %s551_s14  }
   0xe   : > { %p630_p11 = por %p105_p7, %p33_p0  ;;  %p634_p12 = por %p111_p8, %p39_p3 }
   0xf   : > { %s401_s27 = sshll.u32 %s555_s15, 3  ;;  %s390_s28 = sshll.u32 %s137_s26, 3 }
  0x10   : > { %s146_s4 = scalar_lea.hbm %s723_s0, %s401_s27  ;;  %s141_s6 = scalar_lea.vmem [#allocation2], %s390_s28 }
  0x11   : > { %s148_s5 = sshll.u32 %s146_s4, 4  ;;  %s150_s7 = sshll.u32 %s141_s6, 4  ;;  %s149_s5 = int_to_ptr.hbm [resolvable:$true] %s148_s5  ;;  %s151_s7 = int_to_ptr.vmem [resolvable:$true] %s150_s7 }
  0x12   : > { %p645_p13 = pnand %p415_p10, %p619_p5  ;;  %p393_p0 = scmp.ge.s32.totalorder %s555_s15, 1 }
  0x13   : > { %p155_p1 = scmp.lt.s32.totalorder %s555_s15, 3  ;;  %s138_s9 = scalar_lea.sflag [#allocation3], %s137_s26 }
  0x14   : > { %s459_s10 = sshra.s32 %s149_s5, 4  ;;  %p463_p3 = pneg %p645_p13  ;;  %s460_s10 = int_to_ptr.hbm [resolvable:$true] %s459_s10 }
  0x15   : > { %s461_s11 = scalar_lea.hbm %s460_s10, 8  ;;  %s466_s20 = scalar_lea.hbm %s723_s0, 16 }
  0x16   : > { %p462_p2 = scmp.ne.s32.totalorder %s460_s10, %s461_s11  ;;  %p467_p5 = scmp.lt.s32.totalorder %s460_s10, %s723_s0 }
  0x17   : > { %p468_p8 = scmp.lt.s32.totalorder %s466_s20, %s461_s11 }
  0x18   : > { %p464_p4 = pnand %p463_p3, %p462_p2 }
  0x19   : > { %p469_p10 = por %p468_p8, %p467_p5 }
  0x1a   : > { %p465_p7 = pneg %p464_p4 }
  0x1c   : > { %p470_p9 = pnand %p469_p10, %p465_p7 }
  0x1e   : > { %473 = shalt.err (!%p470_p9)
}
  0x1f   : > { %410 = dma.hbm_to_vmem [thread:$0]  (!%p645_p13), %s149_s5, 128, %s151_s7, %s138_s9  }
  0x20   : > { %p156_p2 = pnand %p393_p0, %p155_p1 }
  0x21   : > { %s666_s26 = sand.u32 (!%p156_p2), 1, %s547_s13  }
  0x22   : > { %159 = sbr.rel (%p156_p2) target bundleno = 172 (0xac), region = 32  ;;  %s394_s28 = sshll.u32 (!%p156_p2), %s666_s26, 3 }
  0x23   : > { %s162_s29 = scalar_lea.sflag (!%p156_p2), [#allocation3], %s666_s26  ;;  %s165_s30 = scalar_lea.vmem (!%p156_p2), [#allocation2], %s394_s28 }
  0x27   : > { %534 = dma.done.wait (%p623_p6), %s162_s29, 128  }
  0x28   : > { %536 = vsyncadd (%p623_p6), %s162_s29, 4294967168  ;;  %v557_v0 = vmov 0   ;;  %v277_v1 = vld [vmem:[%s724_s1] sm:$0xf]  ;;  %v558_v2 = vmov 4.0   ;;  %v189_v5 = vld [vmem:[%s165_s30] sm:$0xff] }
  0x29   : > { %452 = vset.pattern.permute.xlu0 %v557_v0  ;;  %453 = vrcp.f32 %v558_v2  ;;  %v288_v3 = vld [vmem:[%s725_s2] sm:$0xf]  ;;  %191 = vst [vmem:[#allocation1] ss:$2 sm:$0xff] %v189_v5  ;;  %vm196_vm0 = vcmask 1043456   ;;  %s402_s23 = sshll.u32 %s601_s16, 3 }
  0x2a   : > { %280 = vperm.xlu0 %452, %v277_v1   ;;  %s312_s10 = scalar_lea.hbm %s726_s3, %s402_s23  ;;  %s188_s11 = scalar_lea.vmem [#allocation5], %s394_s28 }
  0x2b   : > { %s314_s17 = sshll.u32 %s188_s11, 4  ;;  %s316_s19 = sshll.u32 %s312_s10, 4  ;;  %s315_s17 = int_to_ptr.vmem [resolvable:$true] %s314_s17  ;;  %s317_s19 = int_to_ptr.hbm [resolvable:$true] %s316_s19 }
  0x2c   : > { %s301_s20 = scalar_lea.sflag [#allocation4], %s666_s26  ;;  %s503_s22 = sshra.s32 %s317_s19, 4  ;;  %s504_s22 = int_to_ptr.hbm [resolvable:$true] %s503_s22 }
  0x2d   : > { %s505_s16 = scalar_lea.hbm %s504_s22, 8  ;;  %s509_s28 = scalar_lea.hbm %s726_s3, 16 }
  0x2e   : > { %p506_p6 = scmp.ne.s32.totalorder %s504_s22, %s505_s16  ;;  %p510_p0 = scmp.lt.s32.totalorder %s504_s22, %s726_s3 }
  0x2f   : > { %v454_v4 = vpop.eup %453  ;;  %p511_p1 = scmp.lt.s32.totalorder %s509_s28, %s505_s16 }
  0x30   : > { %v212_v6 = vmul.f32 4.0, %v454_v4  ;;  %v193_v8 = vld.sshfl [vmem:[#allocation1 + $0x8] sm:$0xff pattern:$0x75316420]  ;;  %vm216_vm1 = vweird.f32 %v454_v4  ;;  %p507_p9 = pnand %p506_p6, %p630_p11 }
  0x31   : > { %v204_v9 = vsel %vm196_vm0, %v193_v8, 0.0  ;;  %v192_v10 = vld.sshfl [vmem:[#allocation1] sm:$0xff pattern:$0x75316420]  ;;  %p512_p3 = por %p511_p1, %p510_p0 }
  0x32   : > { %291 = vperm.xlu0 %452, %v288_v3   ;;  %v213_v7 = vsub.f32 1.0, %v212_v6  ;;  %v205_v11 = vrot.slane %v204_v9, 4  ;;  %v197_v13 = vsel %vm196_vm0, %v192_v10, 0.0  ;;  %v559_v6 = vmov 839922192   ;;  %p508_p13 = pneg %p507_p9 }
  0x33   : > { %v198_v14 = vrot.slane %v197_v13, 4 }
  0x34   : > { %v214_v12 = vmul.f32 %v454_v4, %v213_v7  ;;  %v206_v15 = vadd.f32 %v205_v11, %v204_v9  ;;  %v283_v7 = vunpack.c.l.s4 %v559_v6  ;;  %p513_p4 = pnand %p512_p3, %p508_p13 }
  0x35   : > { %v199_v16 = vadd.f32 %v198_v14, %v197_v13 }
  0x36   : > { %v207_v17 = vrot.slane %v206_v15, 2  ;;  %v215_v18 = vadd.f32 %v454_v4, %v214_v12  ;;  %v284_v9 = vunpack.c.0.s8 %v283_v7 }
  0x37   : > { %v200_v19 = vrot.slane %v199_v16, 2 }
  0x38   : > { %v208_v20 = vadd.f32 %v207_v17, %v206_v15  ;;  %v217_v23 = vsel %vm216_vm1, %v454_v4, %v215_v18 }
  0x39   : > { %v201_v21 = vadd.f32 %v200_v19, %v199_v16 }
  0x3a   : > { %v209_v22 = vrot.slane %v208_v20, 1 }
  0x3b   : > { %v202_v24 = vrot.slane %v201_v21, 1 }
  0x3c   : > { %v210_v25 = vadd.f32 %v209_v22, %v208_v20 }
  0x3d   : > { %v203_v26 = vadd.f32 %v202_v24, %v201_v21 }
  0x3e   : > { %v219_v27 = vmul.f32 %v217_v23, %v210_v25 }
  0x3f   : > { %v218_v28 = vmul.f32 %v217_v23, %v203_v26 }
  0x40   : > { %v222_v29 = vrot.slane %v219_v27, 4 }
  0x42   : > { %v223_v30 = vsel %vm196_vm0, %v218_v28, %v222_v29 }
  0x43   : > { %v225_v31 = vsub.f32 %v189_v5, %v223_v30 }
  0x45   : > { %v226_v32 = vmul.f32 %v225_v31, %v225_v31 }
  0x47   : > { %228 = vst [vmem:[#allocation1] ss:$2 sm:$0xff] %v226_v32 }
  0x4e   : > { %v230_v33 = vld.sshfl [vmem:[#allocation1 + $0x8] sm:$0xff pattern:$0x75316420]  ;;  %v229_v35 = vld.sshfl [vmem:[#allocation1] sm:$0xff pattern:$0x75316420] }
  0x4f   : > { %v240_v34 = vsel %vm196_vm0, %v230_v33, 0.0  ;;  %v233_v37 = vsel %vm196_vm0, %v229_v35, 0.0 }
  0x50   : > { %v241_v36 = vrot.slane %v240_v34, 4  ;;  %v234_v38 = vrot.slane %v233_v37, 4 }
  0x52   : > { %v242_v39 = vadd.f32 %v241_v36, %v240_v34  ;;  %v235_v40 = vadd.f32 %v234_v38, %v233_v37 }
  0x54   : > { %v243_v41 = vrot.slane %v242_v39, 2  ;;  %v236_v42 = vrot.slane %v235_v40, 2 }
  0x56   : > { %v244_v43 = vadd.f32 %v243_v41, %v242_v39  ;;  %v237_v44 = vadd.f32 %v236_v42, %v235_v40 }
  0x58   : > { %v245_v45 = vrot.slane %v244_v43, 1  ;;  %v238_v46 = vrot.slane %v237_v44, 1 }
  0x5a   : > { %v246_v47 = vadd.f32 %v245_v45, %v244_v43  ;;  %v239_v48 = vadd.f32 %v238_v46, %v237_v44 }
  0x5c   : > { %v248_v49 = vmul.f32 %v246_v47, %v217_v23  ;;  %v247_v50 = vmul.f32 %v239_v48, %v217_v23 }
  0x5e   : > { %v250_v51 = vadd.f32 1e-05, %v248_v49  ;;  %v249_v52 = vadd.f32 1e-05, %v247_v50 }
  0x60   : > { %455 = vrsqrt.f32 %v250_v51  ;;  %vm267_vm2 = vweird.f32 %v250_v51  ;;  %vm257_vm5 = vweird.f32 %v249_v52 }
  0x61   : > { %457 = vrsqrt.f32 %v249_v52 }
  0x66   : > { %v456_v53 = vpop.eup %455 }
  0x67   : > { %v262_v54 = vmul.f32 %v456_v53, %v250_v51  ;;  %v458_v55 = vpop.eup %457  ;;  %vm268_vm3 = vweird.f32 %v456_v53 }
  0x68   : > { %v252_v56 = vmul.f32 %v458_v55, %v249_v52  ;;  %vm269_vm4 = vmor %vm267_vm2, %vm268_vm3  ;;  %vm258_vm6 = vweird.f32 %v458_v55 }
  0x69   : > { %v263_v57 = vmul.f32 %v456_v53, %v262_v54  ;;  %vm259_vm7 = vmor %vm257_vm5, %vm258_vm6 }
  0x6a   : > { %v253_v58 = vmul.f32 %v458_v55, %v252_v56 }
  0x6b   : > { %v264_v59 = vmul.f32 0.5, %v263_v57 }
  0x6c   : > { %v254_v60 = vmul.f32 0.5, %v253_v58 }
  0x6d   : > { %v265_v61 = vsub.f32 1.5, %v264_v59 }
  0x6e   : > { %v255_v62 = vsub.f32 1.5, %v254_v60 }
  0x6f   : > { %v266_v63 = vmul.f32 %v456_v53, %v265_v61 }
  0x70   : > { %v256_v0 = vmul.f32 %v458_v55, %v255_v62 }
  0x71   : > { %v270_v1 = vsel %vm269_vm4, %v456_v53, %v266_v63 }
  0x72   : > { %v273_v2 = vrot.slane %v270_v1, 4  ;;  %v260_v3 = vsel %vm259_vm7, %v458_v55, %v256_v0 }
  0x74   : > { %v274_v4 = vsel %vm196_vm0, %v260_v3, %v273_v2 }
  0x75   : > { %v276_v5 = vmul.f32 %v274_v4, %v225_v31 }
  0x9c   : > { %v281_v8 = vpop.permute.xlu0 %280 }
  0x9d   : > { %v285_v10 = vperm.slane %v281_v8, %v284_v9 }
  0x9f   : > { %v287_v12 = vmul.f32 %v285_v10, %v276_v5 }
  0xa4   : > { %v292_v11 = vpop.permute.xlu0 %291 }
  0xa5   : > { %v296_v13 = vperm.slane %v292_v11, %v284_v9 }
  0xa7   : > { %v298_v14 = vadd.f32 %v296_v13, %v287_v12 }
  0xa9   : > { %299 = vst [vmem:[%s188_s11] sm:$0xff] %v298_v14 }
  0xaa   : > { %516 = shalt.err (!%p513_p4)
}
  0xab   : > { %405 = dma.vmem_to_hbm [thread:$0]  (%p630_p11), %s315_s17, 128, %s317_s19, %s301_s20  }
  0xac PF: > { %s328_s26 = sand.u32 1, %s543_s12   ;;  %p732_p7 = scmp.ge.s32.totalorder %s555_s15, 2 }
  0xad   : > { %s329_s5 = scalar_lea.sflag [#allocation4], %s328_s26 }
  0xae   : > { %p412_p5 = pnand %p732_p7, %p634_p12 }
  0xb0   : > { %p413_p8 = pneg %p412_p5 }
  0xb2   : > { %538 = dma.done.wait (%p413_p8), %s329_s5, 128  }
  0xb3   : > { %540 = vsyncadd (%p413_p8), %s329_s5, 4294967168  ;;  %p16_p10 = scmp.ge.s32.totalorder %s605_s18, 4   ;;  %s733_s12 = smov %s547_s13 }
  0xb4   : > { %s734_s13 = smov %s551_s14  ;;  %s735_s14 = smov %s617_s21 }
  0xb5   : > { %s736_s15 = smov %s605_s18  ;;  %18 = sbr.rel (!%p16_p10) target bundleno = 5 (0x5), region = 77 }
  0xba   :  { %335 = vsyncpa [#allocation3], 1 }
  0xbb   :  { %337 = vsyncpa [#allocation3 + $0x1], 1 }
  0xbc   :  { %338 = vsyncpa [#allocation4], 1 }
  0xbd   :  { %340 = vsyncpa [#allocation4 + $0x1], 1 }

</bundles_post_ra>
